<compile_context>
chip_gen: v7x
topology: tpu7x:2x2x1
jax: 0.10.0
libtpu: 0.0.40
codegen_flags: <defaults>
</compile_context>

<pallas_src>
import functools

import jax
import jax.numpy as jnp
import numpy as np
from jax import lax
from jax.experimental import pallas as pl
from jax.experimental.pallas import tpu as pltpu

# Scaled-down hyper-parameters (original defaults: num_taps=81, win_size=560,
# num_channels=4, spatial_filters=10, spectra_filters=128, spectra_kernels=400).
NUM_TAPS = 5            # K (odd, like 81)
WIN_SIZE = 24           # frame_len (orig 560)
NUM_CHANNELS = 4        # C
SPATIAL_FILTERS = 3     # P (orig 10)
SPECTRA_FILTERS = 8     # F (orig 128)
SPECTRA_KERNELS = 16    # J (orig 400)
FRAME_HOP = WIN_SIZE - SPECTRA_KERNELS      # 8 (orig 160)
LOG_COMPRESS = True

PAD = (NUM_TAPS - 1) // 2
M = WIN_SIZE                                 # frame length
MP = M + 2 * PAD                             # per-frame padded length
R = M - SPECTRA_KERNELS + 1                  # == FRAME_HOP + 1 (max-pool window)


def _beamformer_kernel(c_ref, ws_ref, wc_ref, y_ref, *, C, P, F, M, MP, K, J, R,
                       TB, HOP, log_compress):
    slab = c_ref[...]        # (C, (TB-1)*HOP + MP)  raw audio (globally padded)
    ws = ws_ref[...]         # (P, K*C)
    wc = wc_ref[...]         # (J, F)

    # ---- rebuild torch's per-frame zero padding (Conv2d pad is applied AFTER unfold):
    #      win_t = [0]*PAD ++ frame_t ++ [0]*PAD ;  cpad = win_0 | win_1 | ... | win_{TB-1}
    pad = (K - 1) // 2
    col = lax.broadcasted_iota(jnp.int32, (1, MP), 1)
    mask = jnp.broadcast_to(((col >= pad) & (col < pad + M)).astype(slab.dtype), (C, MP))
    cpad = jnp.concatenate(
        [slab[:, t * HOP:t * HOP + MP] * mask for t in range(TB)], axis=-1)   # (C, TB*MP)

    # ---- spatial grouped conv + channel sum: ONE (P, K*C) x (K*C, .) matmul via im2col.
    #      Valid-conv outputs at columns t*MP + m (m < M) never cross a frame boundary
    #      because each frame block carries its own PAD zeros.
    width = TB * MP - K + 1
    im2col = jnp.concatenate([cpad[:, k:k + width] for k in range(K)], axis=0)  # (K*C, width)
    f_all = jnp.dot(ws, im2col, preferred_element_type=jnp.float32)             # (P, width) f32

    # ---- stack the TB frames: rows t*P + p, M conv outputs per frame ----
    f_stack = jnp.concatenate(
        [f_all[:, t * MP:t * MP + M] for t in range(TB)], axis=0)               # (TB*P, M)
    f_stack = f_stack.astype(ws.dtype)   # bf16 path: bf16 operands on the MXU, f32 accum

    # ---- spectra conv (valid, J taps) fused with the max-pool over R shift positions.
    #      wc stays stationary; each matmul is TB*P rows deep.  acc starts from r=0
    #      (no -inf init needed) and relu is applied after the max, as in torch.
    def spec(r0):
        return jnp.dot(f_stack[:, r0:r0 + J], wc, preferred_element_type=jnp.float32)

    if R <= 32:                      # small / toy configs: full static unroll
        acc = spec(0)
        for r in range(1, R):
            acc = jnp.maximum(acc, spec(r))
    else:                            # production (R=161): bound trace/code size
        def body(r, a):
            blk = lax.dynamic_slice_in_dim(f_stack, r, J, axis=1)
            return jnp.maximum(a, jnp.dot(blk, wc, preferred_element_type=jnp.float32))
        acc = lax.fori_loop(1, R, body, spec(0), unroll=8)

    y = jnp.maximum(acc, 0.0)        # relu (f32)
    if log_compress:
        y = jnp.log(y + 0.01)        # log compression (f32)
    y_ref[...] = y                   # (TB*P, F) slab


def facted_fs_beamformer(x, ws, wc, *, tb=None, compute_dtype=jnp.float32):
    """
    x : (N, C, S) float32 multi-channel audio
    ws: (C, P, K) spatial weights  == torch spatial.weight (C*P,1,K,1).reshape(C,P,K)
    wc: (F, J)    spectra weights  == torch spectra.weight (F,1,J,1).reshape(F,J)
    compute_dtype: jnp.float32, or jnp.bfloat16 for full-rate MXU on v6e/v7x
    returns y: (N, P, F, T) float32
    """
    N, C, S = x.shape
    assert C == NUM_CHANNELS
    assert S >= WIN_SIZE
    P, F, K, J = SPATIAL_FILTERS, SPECTRA_FILTERS, NUM_TAPS, SPECTRA_KERNELS
    T = (S - WIN_SIZE) // FRAME_HOP + 1

    if tb is None:
        # Frame batch: target >= 256 MXU rows (v6e/v7x); 128 already saturates v5e's MXU.
        tb = max(1, min(T, pl.cdiv(256, P)))
    G = pl.cdiv(T, tb)
    T_pad = G * tb
    slab_len = (tb - 1) * FRAME_HOP + MP        # raw samples handed to one grid step

    # ---- glue: pad the audio once and cut per-step overlapping slabs (no nn.Unfold
    #      materialisation: ~1 + (MP-HOP)/(tb*HOP) amplification instead of MP/HOP). ----
    tail = (T_pad - 1) * FRAME_HOP + WIN_SIZE - S      # extra zeros so T_pad frames exist
    x_pad = jnp.pad(x, ((0, 0), (0, 0), (PAD, PAD + tail)))
    starts = jnp.arange(G) * (tb * FRAME_HOP)
    idx = starts[:, None] + jnp.arange(slab_len)[None, :]            # (G, slab_len)
    slabs = jnp.transpose(x_pad[:, :, idx], (0, 2, 1, 3))            # (N, G, C, slab_len)
    slabs = slabs.astype(compute_dtype)

    # ---- weights: fold the K spatial taps into one K*C-deep contraction ----
    # ws_flat[p, k*C + c] = ws[c, p, k]
    ws_flat = jnp.transpose(ws, (1, 2, 0)).reshape(P, K * C).astype(compute_dtype)
    wc_t = jnp.transpose(wc, (1, 0)).astype(compute_dtype)           # (J, F)

    kernel = functools.partial(
        _beamformer_kernel, C=C, P=P, F=F, M=WIN_SIZE, MP=MP, K=K, J=J, R=R,
        TB=tb, HOP=FRAME_HOP, log_compress=LOG_COMPRESS)

    y = pl.pallas_call(
        kernel,
        out_shape=jax.ShapeDtypeStruct((N, G, tb * P, F), jnp.float32),
        grid=(N, G),
        in_specs=[
            pl.BlockSpec((None, None, C, slab_len), lambda n, g: (n, g, 0, 0)),
            pl.BlockSpec((P, K * C), lambda n, g: (0, 0)),   # resident across the grid
            pl.BlockSpec((J, F), lambda n, g: (0, 0)),       # resident across the grid
        ],
        out_specs=pl.BlockSpec((None, None, tb * P, F), lambda n, g: (n, g, 0, 0)),
        compiler_params=pltpu.CompilerParams(
            dimension_semantics=("parallel", "parallel")),   # shards across v7x's 2 TCs
    )(slabs, ws_flat, wc_t)

    # (N, G, tb*P, F) -> (N, T, P, F) -> (N, P, F, T); drop the padded tail frames.
    y = y.reshape(N, G * tb, P, F)[:, :T]
    return jnp.transpose(y, (0, 2, 3, 1))


def reference_forward(x, ws, wc):
    """Pure-JAX mirror of the PyTorch forward (lax.conv in NCHW), f32 ground truth."""
    N, C, S = x.shape
    T = (S - WIN_SIZE) // FRAME_HOP + 1
    P, F, K, J = SPATIAL_FILTERS, SPECTRA_FILTERS, NUM_TAPS, SPECTRA_KERNELS

    # nn.Unfold((frame_len, 1), stride=frame_hop) then view(N, C, frame_len, -1)
    idx = jnp.arange(T)[:, None] * FRAME_HOP + jnp.arange(M)[None, :]
    c = jnp.transpose(x[:, :, idx], (0, 1, 3, 2))                       # (N, C, M, T)

    # grouped spatial Conv2d (pad along the frame-sample axis)
    w_spatial = ws.reshape(C * P, 1, K, 1)                              # OIHW
    f = lax.conv_general_dilated(
        c, w_spatial, window_strides=(1, 1), padding=((PAD, PAD), (0, 0)),
        dimension_numbers=("NCHW", "OIHW", "NCHW"), feature_group_count=C)
    f = f.reshape(N, C, P, M, T).sum(axis=1)                            # sum(chunk(...))

    # spectra Conv2d on (N*P, 1, M, T)
    w_spec = wc.reshape(F, 1, J, 1)
    w = lax.conv_general_dilated(
        f.reshape(N * P, 1, M, T), w_spec, window_strides=(1, 1),
        padding=((0, 0), (0, 0)), dimension_numbers=("NCHW", "OIHW", "NCHW"))

    y = jnp.max(w, axis=2)                    # max_pool2d((frame_hop+1, 1), stride=1)
    y = jnp.maximum(y, 0.0)
    if LOG_COMPRESS:
        y = jnp.log(y + 0.01)
    return y.reshape(N, P, F, T)


def reference_decomposed(x, ws, wc, compute_dtype):
    """Pure-JAX mirror of the *kernel's* decomposition (same dtypes / same rounding
    points) — used to validate the reduced-precision (bf16) path deterministically."""
    N, C, S = x.shape
    T = (S - WIN_SIZE) // FRAME_HOP + 1
    P, F, K, J = SPATIAL_FILTERS, SPECTRA_FILTERS, NUM_TAPS, SPECTRA_KERNELS

    idx = jnp.arange(T)[:, None] * FRAME_HOP + jnp.arange(M)[None, :]
    frames = x[:, :, idx].astype(compute_dtype)                         # (N, C, T, M)
    frames = jnp.pad(frames, ((0, 0), (0, 0), (0, 0), (PAD, PAD)))      # (N, C, T, MP)

    ws_flat = jnp.transpose(ws, (1, 2, 0)).reshape(P, K * C).astype(compute_dtype)
    wc_t = jnp.transpose(wc, (1, 0)).astype(compute_dtype)              # (J, F)

    cols = jnp.stack([frames[..., k:k + M] for k in range(K)], axis=1)  # (N, K, C, T, M)
    cols = jnp.transpose(cols, (0, 3, 1, 2, 4)).reshape(N, T, K * C, M)
    f = jnp.einsum("pq,ntqm->ntpm", ws_flat, cols,
                   preferred_element_type=jnp.float32).astype(compute_dtype)

    acc = jnp.einsum("ntpj,jf->ntpf", f[..., 0:J], wc_t,
                     preferred_element_type=jnp.float32)
    for r in range(1, R):
        acc = jnp.maximum(acc, jnp.einsum("ntpj,jf->ntpf", f[..., r:r + J], wc_t,
                                          preferred_element_type=jnp.float32))
    y = jnp.maximum(acc, 0.0)
    if LOG_COMPRESS:
        y = jnp.log(y + 0.01)
    return jnp.transpose(y, (0, 2, 3, 1))                               # (N, P, F, T)


if __name__ == "__main__":
    key = jax.random.PRNGKey(0)
    kx, kws, kwc = jax.random.split(key, 3)

    N, C = 2, NUM_CHANNELS
    T = 7                                         # odd on purpose: exercises the padded tail
    S = WIN_SIZE + (T - 1) * FRAME_HOP            # 72 samples -> T = 7 frames
    x = jax.random.normal(kx, (N, C, S), jnp.float32)
    ws = 0.1 * jax.random.normal(kws, (C, SPATIAL_FILTERS, NUM_TAPS), jnp.float32)
    wc = 0.1 * jax.random.normal(kwc, (SPECTRA_FILTERS, SPECTRA_KERNELS), jnp.float32)

    # f32 path: strict check against the torch-mirroring (lax.conv) reference.
    y = jax.block_until_ready(facted_fs_beamformer(x, ws, wc, tb=4))
    y_ref = reference_forward(x, ws, wc)
    assert y.shape == (N, SPATIAL_FILTERS, SPECTRA_FILTERS, T), y.shape
    np.testing.assert_allclose(np.asarray(y), np.asarray(y_ref), rtol=1e-3, atol=1e-3)

    # bf16 path (v6e/v7x): bf16 operands on the MXU, f32 accumulation.  Checked against
    # a pure-JAX mirror of the same decomposition; tolerance is loose because the final
    # log(y + 0.01) amplifies tiny differences when y is near zero.
    y_bf16 = jax.block_until_ready(
        facted_fs_beamformer(x, ws, wc, tb=4, compute_dtype=jnp.bfloat16))
    y_bf16_ref = reference_decomposed(x, ws, wc, jnp.bfloat16)
    assert np.all(np.isfinite(np.asarray(y_bf16)))
    np.testing.assert_allclose(np.asarray(y_bf16), np.asarray(y_bf16_ref),
                               rtol=1e-1, atol=1e-1)

    print("KERNEL_OK")
</pallas_src>

<mosaic_0001>
module attributes {stable_mosaic.version = 11 : i64} {
  func.func @_beamformer_kernel(%arg0: i32, %arg1: i32, %arg2: memref<1x1x4x52xf32, #tpu.memory_space<vmem>>, %arg3: memref<3x20xf32, #tpu.memory_space<vmem>>, %arg4: memref<16x8xf32, #tpu.memory_space<vmem>>, %arg5: memref<1x1x12x8xf32, #tpu.memory_space<vmem>>) attributes {dimension_semantics = [#tpu.dimension_semantics<parallel>, #tpu.dimension_semantics<parallel>], iteration_bounds = array<i64: 2, 2>, scalar_prefetch = 0 : i64, scratch_operands = 0 : i64, tpu.core_type = #tpu.core_type<tc>, window_params = [{transform_indices = @transform_0, window_bounds = array<i64: 1, 1, 4, 52>}, {pipeline_mode = #tpu.pipeline_mode<synchronous>, transform_indices = @transform_1, window_bounds = array<i64: 3, 20>}, {pipeline_mode = #tpu.pipeline_mode<synchronous>, transform_indices = @transform_2, window_bounds = array<i64: 16, 8>}, {transform_indices = @transform_3, window_bounds = array<i64: 1, 1, 12, 8>}]} {
    %c0 = arith.constant 0 : index
    %c0_0 = arith.constant 0 : index
    %c0_1 = arith.constant 0 : index
    %c0_2 = arith.constant 0 : index
    %0 = vector.load %arg2[%c0, %c0_0, %c0_1, %c0_2] : memref<1x1x4x52xf32, #tpu.memory_space<vmem>>, vector<1x1x4x52xf32>
    %1 = vector.shape_cast %0 : vector<1x1x4x52xf32> to vector<4x52xf32>
    %c0_3 = arith.constant 0 : index
    %c0_4 = arith.constant 0 : index
    %2 = vector.load %arg3[%c0_3, %c0_4] : memref<3x20xf32, #tpu.memory_space<vmem>>, vector<3x20xf32>
    %c0_5 = arith.constant 0 : index
    %c0_6 = arith.constant 0 : index
    %3 = vector.load %arg4[%c0_5, %c0_6] : memref<16x8xf32, #tpu.memory_space<vmem>>, vector<16x8xf32>
    %4 = tpu.iota {dimensions = array<i32: 1>} : vector<1x28xi32>
    %c2_i32 = arith.constant 2 : i32
    %5 = vector.broadcast %c2_i32 : i32 to vector<1x28xi32>
    %6 = arith.cmpi sge, %4, %5 : vector<1x28xi32>
    %c26_i32 = arith.constant 26 : i32
    %7 = vector.broadcast %c26_i32 : i32 to vector<1x28xi32>
    %8 = arith.cmpi slt, %4, %7 : vector<1x28xi32>
    %9 = arith.andi %6, %8 : vector<1x28xi1>
    %10 = arith.extui %9 : vector<1x28xi1> to vector<1x28xi32>
    %11 = arith.sitofp %10 : vector<1x28xi32> to vector<1x28xf32>
    %12 = vector.shape_cast %11 : vector<1x28xf32> to vector<1x28xf32>
    %13 = vector.broadcast %12 : vector<1x28xf32> to vector<4x28xf32>
    %14 = vector.extract_strided_slice %1 {offsets = [0, 0], sizes = [4, 28], strides = [1, 1]} : vector<4x52xf32> to vector<4x28xf32>
    %15 = arith.mulf %14, %13 : vector<4x28xf32>
    %16 = vector.extract_strided_slice %1 {offsets = [0, 8], sizes = [4, 28], strides = [1, 1]} : vector<4x52xf32> to vector<4x28xf32>
    %17 = arith.mulf %16, %13 : vector<4x28xf32>
    %18 = vector.extract_strided_slice %1 {offsets = [0, 16], sizes = [4, 28], strides = [1, 1]} : vector<4x52xf32> to vector<4x28xf32>
    %19 = arith.mulf %18, %13 : vector<4x28xf32>
    %20 = vector.extract_strided_slice %1 {offsets = [0, 24], sizes = [4, 28], strides = [1, 1]} : vector<4x52xf32> to vector<4x28xf32>
    %21 = arith.mulf %20, %13 : vector<4x28xf32>
    %22 = tpu.concatenate %15, %17, %19, %21 in 1 : vector<4x28xf32>, vector<4x28xf32>, vector<4x28xf32>, vector<4x28xf32> -> vector<4x112xf32>
    %23 = vector.extract_strided_slice %22 {offsets = [0, 0], sizes = [4, 108], strides = [1, 1]} : vector<4x112xf32> to vector<4x108xf32>
    %24 = vector.extract_strided_slice %22 {offsets = [0, 1], sizes = [4, 108], strides = [1, 1]} : vector<4x112xf32> to vector<4x108xf32>
    %25 = vector.extract_strided_slice %22 {offsets = [0, 2], sizes = [4, 108], strides = [1, 1]} : vector<4x112xf32> to vector<4x108xf32>
    %26 = vector.extract_strided_slice %22 {offsets = [0, 3], sizes = [4, 108], strides = [1, 1]} : vector<4x112xf32> to vector<4x108xf32>
    %27 = vector.extract_strided_slice %22 {offsets = [0, 4], sizes = [4, 108], strides = [1, 1]} : vector<4x112xf32> to vector<4x108xf32>
    %28 = tpu.concatenate %23, %24, %25, %26, %27 in 0 : vector<4x108xf32>, vector<4x108xf32>, vector<4x108xf32>, vector<4x108xf32>, vector<4x108xf32> -> vector<20x108xf32>
    %cst = arith.constant dense<0.000000e+00> : vector<3x108xf32>
    %29 = tpu.matmul %2, %28, %cst {dimension_numbers = #tpu.dot_dimension_numbers<[1], [0], [0], [1], [0, 0, 1, 1], [], []>} : vector<3x20xf32>, vector<20x108xf32>, vector<3x108xf32> -> vector<3x108xf32>
    %30 = vector.extract_strided_slice %29 {offsets = [0, 0], sizes = [3, 24], strides = [1, 1]} : vector<3x108xf32> to vector<3x24xf32>
    %31 = vector.extract_strided_slice %29 {offsets = [0, 28], sizes = [3, 24], strides = [1, 1]} : vector<3x108xf32> to vector<3x24xf32>
    %32 = vector.extract_strided_slice %29 {offsets = [0, 56], sizes = [3, 24], strides = [1, 1]} : vector<3x108xf32> to vector<3x24xf32>
    %33 = vector.extract_strided_slice %29 {offsets = [0, 84], sizes = [3, 24], strides = [1, 1]} : vector<3x108xf32> to vector<3x24xf32>
    %34 = tpu.concatenate %30, %31, %32, %33 in 0 : vector<3x24xf32>, vector<3x24xf32>, vector<3x24xf32>, vector<3x24xf32> -> vector<12x24xf32>
    %35 = vector.extract_strided_slice %34 {offsets = [0, 0], sizes = [12, 16], strides = [1, 1]} : vector<12x24xf32> to vector<12x16xf32>
    %cst_7 = arith.constant dense<0.000000e+00> : vector<12x8xf32>
    %36 = tpu.matmul %35, %3, %cst_7 {dimension_numbers = #tpu.dot_dimension_numbers<[1], [0], [0], [1], [0, 0, 1, 1], [], []>} : vector<12x16xf32>, vector<16x8xf32>, vector<12x8xf32> -> vector<12x8xf32>
    %37 = vector.extract_strided_slice %34 {offsets = [0, 1], sizes = [12, 16], strides = [1, 1]} : vector<12x24xf32> to vector<12x16xf32>
    %cst_8 = arith.constant dense<0.000000e+00> : vector<12x8xf32>
    %38 = tpu.matmul %37, %3, %cst_8 {dimension_numbers = #tpu.dot_dimension_numbers<[1], [0], [0], [1], [0, 0, 1, 1], [], []>} : vector<12x16xf32>, vector<16x8xf32>, vector<12x8xf32> -> vector<12x8xf32>
    %39 = arith.maximumf %36, %38 : vector<12x8xf32>
    %40 = vector.extract_strided_slice %34 {offsets = [0, 2], sizes = [12, 16], strides = [1, 1]} : vector<12x24xf32> to vector<12x16xf32>
    %cst_9 = arith.constant dense<0.000000e+00> : vector<12x8xf32>
    %41 = tpu.matmul %40, %3, %cst_9 {dimension_numbers = #tpu.dot_dimension_numbers<[1], [0], [0], [1], [0, 0, 1, 1], [], []>} : vector<12x16xf32>, vector<16x8xf32>, vector<12x8xf32> -> vector<12x8xf32>
    %42 = arith.maximumf %39, %41 : vector<12x8xf32>
    %43 = vector.extract_strided_slice %34 {offsets = [0, 3], sizes = [12, 16], strides = [1, 1]} : vector<12x24xf32> to vector<12x16xf32>
    %cst_10 = arith.constant dense<0.000000e+00> : vector<12x8xf32>
    %44 = tpu.matmul %43, %3, %cst_10 {dimension_numbers = #tpu.dot_dimension_numbers<[1], [0], [0], [1], [0, 0, 1, 1], [], []>} : vector<12x16xf32>, vector<16x8xf32>, vector<12x8xf32> -> vector<12x8xf32>
    %45 = arith.maximumf %42, %44 : vector<12x8xf32>
    %46 = vector.extract_strided_slice %34 {offsets = [0, 4], sizes = [12, 16], strides = [1, 1]} : vector<12x24xf32> to vector<12x16xf32>
    %cst_11 = arith.constant dense<0.000000e+00> : vector<12x8xf32>
    %47 = tpu.matmul %46, %3, %cst_11 {dimension_numbers = #tpu.dot_dimension_numbers<[1], [0], [0], [1], [0, 0, 1, 1], [], []>} : vector<12x16xf32>, vector<16x8xf32>, vector<12x8xf32> -> vector<12x8xf32>
    %48 = arith.maximumf %45, %47 : vector<12x8xf32>
    %49 = vector.extract_strided_slice %34 {offsets = [0, 5], sizes = [12, 16], strides = [1, 1]} : vector<12x24xf32> to vector<12x16xf32>
    %cst_12 = arith.constant dense<0.000000e+00> : vector<12x8xf32>
    %50 = tpu.matmul %49, %3, %cst_12 {dimension_numbers = #tpu.dot_dimension_numbers<[1], [0], [0], [1], [0, 0, 1, 1], [], []>} : vector<12x16xf32>, vector<16x8xf32>, vector<12x8xf32> -> vector<12x8xf32>
    %51 = arith.maximumf %48, %50 : vector<12x8xf32>
    %52 = vector.extract_strided_slice %34 {offsets = [0, 6], sizes = [12, 16], strides = [1, 1]} : vector<12x24xf32> to vector<12x16xf32>
    %cst_13 = arith.constant dense<0.000000e+00> : vector<12x8xf32>
    %53 = tpu.matmul %52, %3, %cst_13 {dimension_numbers = #tpu.dot_dimension_numbers<[1], [0], [0], [1], [0, 0, 1, 1], [], []>} : vector<12x16xf32>, vector<16x8xf32>, vector<12x8xf32> -> vector<12x8xf32>
    %54 = arith.maximumf %51, %53 : vector<12x8xf32>
    %55 = vector.extract_strided_slice %34 {offsets = [0, 7], sizes = [12, 16], strides = [1, 1]} : vector<12x24xf32> to vector<12x16xf32>
    %cst_14 = arith.constant dense<0.000000e+00> : vector<12x8xf32>
    %56 = tpu.matmul %55, %3, %cst_14 {dimension_numbers = #tpu.dot_dimension_numbers<[1], [0], [0], [1], [0, 0, 1, 1], [], []>} : vector<12x16xf32>, vector<16x8xf32>, vector<12x8xf32> -> vector<12x8xf32>
    %57 = arith.maximumf %54, %56 : vector<12x8xf32>
    %58 = vector.extract_strided_slice %34 {offsets = [0, 8], sizes = [12, 16], strides = [1, 1]} : vector<12x24xf32> to vector<12x16xf32>
    %cst_15 = arith.constant dense<0.000000e+00> : vector<12x8xf32>
    %59 = tpu.matmul %58, %3, %cst_15 {dimension_numbers = #tpu.dot_dimension_numbers<[1], [0], [0], [1], [0, 0, 1, 1], [], []>} : vector<12x16xf32>, vector<16x8xf32>, vector<12x8xf32> -> vector<12x8xf32>
    %60 = arith.maximumf %57, %59 : vector<12x8xf32>
    %cst_16 = arith.constant 0.000000e+00 : f32
    %61 = vector.broadcast %cst_16 : f32 to vector<12x8xf32>
    %62 = arith.maximumf %60, %61 : vector<12x8xf32>
    %cst_17 = arith.constant 0.00999999977 : f32
    %63 = vector.broadcast %cst_17 : f32 to vector<12x8xf32>
    %64 = arith.addf %62, %63 : vector<12x8xf32>
    %65 = math.log %64 : vector<12x8xf32>
    %c0_18 = arith.constant 0 : index
    %c0_19 = arith.constant 0 : index
    %c0_20 = arith.constant 0 : index
    %c0_21 = arith.constant 0 : index
    %66 = vector.load %arg5[%c0_18, %c0_19, %c0_20, %c0_21] : memref<1x1x12x8xf32, #tpu.memory_space<vmem>>, vector<1x1x12x8xf32>
    %67 = vector.shape_cast %66 : vector<1x1x12x8xf32> to vector<12x8xf32>
    %68 = vector.shape_cast %65 : vector<12x8xf32> to vector<1x1x12x8xf32>
    tpu.vector_store %arg5[%c0_18, %c0_19, %c0_20, %c0_21], %68 {strides = array<i32>} : memref<1x1x12x8xf32, #tpu.memory_space<vmem>>, vector<1x1x12x8xf32>,
    return
  }
  func.func @transform_0(%arg0: i32, %arg1: i32) -> (i32, i32, i32, i32) {
    %c0_i32 = arith.constant 0 : i32
    %c0_i32_0 = arith.constant 0 : i32
    %c0_i32_1 = arith.constant 0 : i32
    return %arg0, %arg1, %c0_i32, %c0_i32_0 : i32, i32, i32, i32
  }
  func.func @transform_1(%arg0: i32, %arg1: i32) -> (i32, i32) {
    %c0_i32 = arith.constant 0 : i32
    %c0_i32_0 = arith.constant 0 : i32
    %c0_i32_1 = arith.constant 0 : i32
    return %c0_i32, %c0_i32_0 : i32, i32
  }
  func.func @transform_2(%arg0: i32, %arg1: i32) -> (i32, i32) {
    %c0_i32 = arith.constant 0 : i32
    %c0_i32_0 = arith.constant 0 : i32
    %c0_i32_1 = arith.constant 0 : i32
    return %c0_i32, %c0_i32_0 : i32, i32
  }
  func.func @transform_3(%arg0: i32, %arg1: i32) -> (i32, i32, i32, i32) {
    %c0_i32 = arith.constant 0 : i32
    %c0_i32_0 = arith.constant 0 : i32
    %c0_i32_1 = arith.constant 0 : i32
    return %arg0, %arg1, %c0_i32, %c0_i32_0 : i32, i32, i32, i32
  }
}

</mosaic_0001>

<bundles_post_ra>
// kernel: tpu_custom_call.1
= control target key start
LH: loop header
LB: loop body
LE: loop exit
PB: predicated region body
PF: predicated region fallthrough
CT: control target
= control target key end

     0   :  { %s1552_s12 = smov 0   ;;  %s1554_s13 = smov 0   ;;  %s1665_s0 = inlined_call_operand.vmem [shape: f32[2,2,4,52], index: 0, kind: input, shape index: {}]   ;;  %s1666_s1 = inlined_call_operand.vmem [shape: f32[3,20], index: 1, kind: input, shape index: {}]   ;;  %s1667_s2 = inlined_call_operand.vmem [shape: f32[16,8], index: 2, kind: input, shape index: {}]   ;;  %s1668_s3 = inlined_call_operand.vmem [shape: f32[2,2,12,8], index: 3, kind: output, shape index: {}]  }
   0x1   :  { %s1556_s14 = smov 0   ;;  %s1558_s15 = smov 0  }
   0x2   :  { %s1560_s16 = smov 0  }
   0x3 LB: > { %s22_s17 = sadd.s32 1, %s1502_s14  ;;  %s25_s18 = sadd.s32 1, %s1506_s15  ;;  %s1510_s16 = sphi %s1560_s16, %s13_s16   ;;  %s1506_s15 = sphi %s1558_s15, %s1672_s15   ;;  %s1502_s14 = sphi %s1556_s14, %s1671_s14   ;;  %s1498_s13 = sphi %s1554_s13, %s1670_s13   ;;  %s1494_s12 = sphi %s1552_s12, %s1669_s12  }
   0x4   : > { %p23_p0 = scmp.ge.s32.totalorder %s22_s17, 2  ;;  %p1228_p1 = scmp.ge.s32.totalorder %s1510_s16, 1 }
   0x5   : > { %p156_p2 = scmp.lt.s32.totalorder %s1510_s16, 5 }
   0x6   : > { %s1674_s17 = smov (%p23_p0, %s22_s17), 0  ;;  %s1676_s18 = smov (!%p23_p0, %s25_s18), %s1506_s15 }
   0x7   : > { %p157_p3 = pnand %p1228_p1, %p156_p2  ;;  %p27_p4 = scmp.ge.s32.totalorder %s1676_s18, 2 }
   0x8   : > { %v208_v0 = vlaneseq (!%p157_p3)  ;;  %p187_p5 = scmp.lt.s32.totalorder (!%p157_p3), %s1498_s13, 1  ;;  %p189_p6 = scmp.lt.s32.totalorder (!%p157_p3), %s1494_s12, 1  ;;  %v1512_v2 = vmov (!%p157_p3), 0.0   ;;  %vm241_vm3 = vcmask (!%p157_p3), 228352   ;;  %v1519_v13 = vmov (!%p157_p3), 0.0|0.0   ;;  %v206_v28 = vld [vmem:[%s1667_s2] sm:$0xff] (!%p157_p3) }
   0x9   : > { %s1678_s18 = smov (%p27_p4, %s1676_s18), 0  ;;  %160 = sbr.rel (%p157_p3) target bundleno = 1092 (0x444), region = 32 }
   0xa   : > { %v209_v1 = vand.u32 (!%p157_p3), 127, %v208_v0  ;;  %s1513_s21 = smov (!%p157_p3), 8   ;;  %s1514_s22 = smov (!%p157_p3), 24   ;;  %1369 = vmatprep.subr.bf16.mxu0 (!%p157_p3), %v1519_v13  ;;  %vm243_vm4 = vcmask (!%p157_p3), 457728   ;;  %vm245_vm5 = vcmask (!%p157_p3), 687104   ;;  %vm1521_vm6 = vmmov (!%p157_p3), 0  }
   0xb   : > { %s1515_s24 = smov (!%p157_p3), 16   ;;  %s1516_s4 = smov (!%p157_p3), 20   ;;  %1303 = vmatprep.mubr.msk.f32.mxu0 (!%p157_p3), %vm1521_vm6, %v1512_v2  ;;  %vm260_vm7 = vcmask (!%p157_p3), 1043456   ;;  %v205_v26 = vld [vmem:[%s1666_s1] sm:$0x7] (!%p157_p3)  ;;  %vm263_vm8 = vcmask (!%p157_p3), 162816  }
   0xc   : > { %vm210_vm0 = vcmp.ge.s32.totalorder (!%p157_p3), %v209_v1, 2  ;;  %vm211_vm1 = vcmp.lt.s32.totalorder (!%p157_p3), %v209_v1, 26  ;;  %s1517_s5 = smov (!%p157_p3), 40   ;;  %s1518_s6 = smov (!%p157_p3), 60   ;;  %v207_v29 = vld [vmem:[%s1667_s2 + $0x8] sm:$0xff] (!%p157_p3)  ;;  %vm352_vm9 = vcmask (!%p157_p3), 1042432  }
   0xd   : > { %vm212_vm2 = vmand (!%p157_p3), %vm210_vm0, %vm211_vm1  ;;  %s1520_s7 = smov (!%p157_p3), 126   ;;  %s1522_s8 = smov (!%p157_p3), 127   ;;  %v1600_v30 = vpack.c.bf16 (!%p157_p3), %v207_v29, %v206_v28  ;;  %vm354_vm10 = vcmask (!%p157_p3), 1045504   ;;  %vm358_vm11 = vcmask (!%p157_p3), 130048   ;;  %vm356_vm12 = vcmask (!%p157_p3), 1040384  }
   0xe   : > { %v1234_v3 = vsel (!%p157_p3), %vm212_vm2, 1.0, %v1512_v2  ;;  %s1523_s9 = smov (!%p157_p3), 124   ;;  %s1524_s10 = smov (!%p157_p3), 125   ;;  %vm1130_vm13 = vcmask (!%p157_p3), 60416   ;;  %vm1128_vm14 = vcmask (!%p157_p3), 64512  }
   0xf   : > { %217 = vrot.lane.b32.xlu0 (!%p157_p3), %v1234_v3, %s1513_s21  ;;  %225 = vrot.lane.b32.xlu1 (!%p157_p3), %v1234_v3, %s1514_s22  ;;  %s1525_s22 = smov (!%p157_p3), 72   ;;  %s1530_s28 = smov (!%p157_p3), 121  }
  0x10   : > { %s1680_s13 = smov (!%p187_p5, %s1498_s13), 1  ;;  %s1682_s12 = smov (!%p189_p6, %s1494_s12), 1  ;;  %1373 = vmatprep.subr.bf16.mxu1 %v1600_v30 }
  0x11   : > { %s1232_s19 = sshll.u32 %s1680_s13, 2  ;;  %s1231_s20 = sshll.u32 %s1682_s12, 1  ;;  %1375 = vmatpush3.bf16.msra.mxu1 %v1600_v30 }
  0x12   : > { %s1582_s23 = sadd.s32 %s1232_s19, %s1231_s20  ;;  %s1229_s25 = sshll.u32 %s1680_s13, 1  ;;  %1377 = vmatprep.subr.bf16.mxu1 %v1600_v30 }
  0x13   : > { %221 = vrot.lane.b32.xlu0 %v1234_v3, %s1515_s24  ;;  %s192_s26 = sadd.s32 %s1229_s25, %s1682_s12  ;;  %s1526_s24 = smov 100  }
  0x14   : > { %s1230_s27 = sshll.u32 %s192_s26, 2  ;;  %s1527_s25 = smov 44  }
  0x15   : > { %s194_s30 = scalar_lea.vmem %s1665_s0, %s1230_s27  ;;  %s1528_s26 = smov 123  }
  0x16   : > { %v204_v4 = vld [vmem:[%s194_s30] sm:$0xf]  ;;  %s1529_s27 = smov 122   ;;  %s1531_s29 = smov 120  }
  0x17   : > { %v215_v12 = vmul.f32 %v1234_v3, %v204_v4  ;;  %s1233_s30 = sshll.u32 %s1582_s23, 3 }
  0x81   : > { %v218_v5 = vpop.permute.xlu0 %217  ;;  %v226_v6 = vpop.permute.xlu1 %225 }
  0x82   : > { %v220_v7 = vmul.f32 %v218_v5, %v204_v4  ;;  %v228_v8 = vmul.f32 %v226_v6, %v204_v4 }
  0x84   : > { %230 = vrot.lane.b32.xlu1 %v220_v7, %s1516_s4 }
  0x85   : > { %v222_v9 = vpop.permute.xlu0 %221 }
  0x86   : > { %v224_v10 = vmul.f32 %v222_v9, %v204_v4 }
  0x88   : > { %234 = vrot.lane.b32.xlu0 %v224_v10, %s1517_s5  ;;  %238 = vrot.lane.b32.xlu1 %v228_v8, %s1518_s6  ;;  %s203_s6 = scalar_lea.vmem %s1668_s3, %s1233_s30 }
  0xf6   : > { %v231_v11 = vpop.permute.xlu1 %230 }
  0xf7   : > { %v242_v14 = vsel %vm241_vm3, %v215_v12, %v231_v11 }
  0xfa   : > { %v235_v15 = vpop.permute.xlu0 %234  ;;  %v239_v16 = vpop.permute.xlu1 %238 }
  0xfb   : > { %v244_v17 = vsel %vm243_vm4, %v242_v14, %v235_v15 }
  0xfc   : > { %v246_v18 = vsel %vm245_vm5, %v244_v17, %v239_v16 }
  0xfd   : > { %252 = vrot.lane.b32.xlu1 %v246_v18, %s1520_s7  ;;  %v248_v19 = vrot.slane %v246_v18, 4 }
  0xff   : > { %249 = vrot.lane.b32.xlu0 %v248_v19, %s1522_s8 }
 0x101   : > { %258 = vrot.lane.b32.xlu1 %v246_v18, %s1523_s9 }
 0x103   : > { %255 = vrot.lane.b32.xlu0 %v248_v19, %s1524_s10 }
 0x16f   : > { %v253_v21 = vpop.permute.xlu1 %252 }
 0x171   : > { %v250_v20 = vpop.permute.xlu0 %249 }
 0x172   : > { %v261_v23 = vsel %vm260_vm7, %v246_v18, %v250_v20 }
 0x173   : > { %v259_v27 = vpop.permute.xlu1 %258 }
 0x175   : > { %v256_v22 = vpop.permute.xlu0 %255 }
 0x176   : > { %v262_v24 = vsel %vm260_vm7, %v253_v21, %v256_v22 }
 0x177   : > { %v1370_v25 = vpack.c.bf16 %v262_v24, %v261_v23 }
 0x179   : > { %1371 = vmatpush3.bf16.msra.mxu0 %v1370_v25 }
 0x17a   : > { %1301 = vmatprep.subr.mxu0 %v1512_v2 }
 0x17d   : > { %1302 = vmatpush3.msk.msra.mxu0 %vm260_vm7, %v259_v27 }
 0x17e   : > { %1304 = vmatmul.mubr.msk.f32.vlgmr.msra.gmra.mrb[0].mxu0 %vm263_vm8, %v205_v26  ;;  %1381 = vmatprep.subr.bf16.mxu0 %v1600_v30 }
 0x17f   : > { %1383 = vmatpush3.bf16.msra.mxu0 %v1600_v30 }
 0x180   : > { %1389 = vmatprep.subr.bf16.mxu0 %v1600_v30 }
 0x251   : > { %v335_v31 = vpop.f32.mrb[0].mxu0 }
 0x252   : > { %v1305_v32 = vpop.f32.mrb[1].mxu0  ;;  %v344_v33 = vrot.slane %v335_v31, 2  ;;  %v340_v34 = vrot.slane %v335_v31, 5  ;;  %v348_v35 = vrot.slane %v335_v31, 7 }
 0x254   : > { %345 = vrot.lane.b32.xlu1 %v344_v33, %s1525_s22  ;;  %341 = vrot.lane.b32.xlu0 %v340_v34, %s1526_s24 }
 0x258   : > { %349 = vrot.lane.b32.xlu0 %v348_v35, %s1527_s25 }
 0x2c6   : > { %v346_v36 = vpop.permute.xlu1 %345  ;;  %v342_v37 = vpop.permute.xlu0 %341 }
 0x2c7   : > { %v353_v38 = vsel %vm352_vm9, %v335_v31, %v342_v37 }
 0x2c8   : > { %v355_v39 = vsel %vm354_vm10, %v353_v38, %v346_v36 }
 0x2c9   : > { %440 = vrot.lane.b32.xlu1 %v355_v39, %s1522_s8  ;;  %1310 = vmatprep.mubr.msk.f32.mxu1 %vm358_vm11, %v355_v39 }
 0x2ca   : > { %v350_v40 = vpop.permute.xlu0 %349 }
 0x2cb   : > { %v357_v41 = vsel %vm356_vm12, %v346_v36, %v350_v40 }
 0x2cc   : > { %442 = vrot.lane.b32.xlu0 %v357_v41, %s1522_s8  ;;  %1311 = vmatmul.mubr.msk.f32.vlgmr.msra.gmra.mrb[0].mxu1 %vm358_vm11, %v357_v41 }
 0x2cd   : > { %525 = vrot.lane.b32.xlu1 %v355_v39, %s1520_s7  ;;  %1379 = vmatpush3.bf16.msra.mxu1 %v1600_v30 }
 0x2ce   : > { %1385 = vmatprep.subr.bf16.mxu1 %v1600_v30 }
 0x2d0   : > { %527 = vrot.lane.b32.xlu0 %v357_v41, %s1520_s7 }
 0x2d1   : > { %610 = vrot.lane.b32.xlu1 %v355_v39, %s1524_s10 }
 0x2d4   : > { %612 = vrot.lane.b32.xlu0 %v357_v41, %s1524_s10 }
 0x2d5   : > { %695 = vrot.lane.b32.xlu1 %v355_v39, %s1523_s9 }
 0x2d8   : > { %697 = vrot.lane.b32.xlu0 %v357_v41, %s1523_s9 }
 0x2d9   : > { %780 = vrot.lane.b32.xlu1 %v355_v39, %s1528_s26 }
 0x2dc   : > { %782 = vrot.lane.b32.xlu0 %v357_v41, %s1528_s26 }
 0x2dd   : > { %865 = vrot.lane.b32.xlu1 %v355_v39, %s1529_s27 }
 0x2e0   : > { %867 = vrot.lane.b32.xlu0 %v357_v41, %s1529_s27 }
 0x2e1   : > { %950 = vrot.lane.b32.xlu1 %v355_v39, %s1530_s28 }
 0x2e4   : > { %952 = vrot.lane.b32.xlu0 %v357_v41, %s1530_s28 }
 0x2e5   : > { %1035 = vrot.lane.b32.xlu1 %v355_v39, %s1531_s29 }
 0x2e8   : > { %1037 = vrot.lane.b32.xlu0 %v357_v41, %s1531_s29 }
 0x33b   : > { %v441_v42 = vpop.permute.xlu1 %440 }
 0x33c   : > { %1317 = vmatprep.mubr.msk.f32.mxu1 %vm358_vm11, %v441_v42 }
 0x33e   : > { %v443_v43 = vpop.permute.xlu0 %442 }
 0x33f   : > { %v526_v44 = vpop.permute.xlu1 %525  ;;  %1318 = vmatmul.mubr.msk.f32.vlgmr.msra.gmra.mrb[2].mxu1 %vm358_vm11, %v443_v43 }
 0x340   : > { %1324 = vmatprep.mubr.msk.f32.mxu0 %vm358_vm11, %v526_v44  ;;  %1387 = vmatpush3.bf16.msra.mxu1 %v1600_v30 }
 0x341   : > { %1393 = vmatprep.subr.bf16.mxu1 %v1600_v30 }
 0x342   : > { %v528_v45 = vpop.permute.xlu0 %527 }
 0x343   : > { %v611_v46 = vpop.permute.xlu1 %610  ;;  %1325 = vmatmul.mubr.msk.f32.vlgmr.msra.gmra.mrb[2].mxu0 %vm358_vm11, %v528_v45 }
 0x344   : > { %1331 = vmatprep.mubr.msk.f32.mxu1 %vm358_vm11, %v611_v46  ;;  %1391 = vmatpush3.bf16.msra.mxu0 %v1600_v30 }
 0x345   : > { %1397 = vmatprep.subr.bf16.mxu0 %v1600_v30 }
 0x346   : > { %v613_v47 = vpop.permute.xlu0 %612 }
 0x347   : > { %v696_v48 = vpop.permute.xlu1 %695  ;;  %1332 = vmatmul.mubr.msk.f32.vlgmr.msra.gmra.mrb[4].mxu1 %vm358_vm11, %v613_v47 }
 0x348   : > { %1338 = vmatprep.mubr.msk.f32.mxu0 %vm358_vm11, %v696_v48  ;;  %1395 = vmatpush3.bf16.msra.mxu1 %v1600_v30 }
 0x349   : > { %1401 = vmatprep.subr.bf16.mxu1 %v1600_v30 }
 0x34a   : > { %v698_v49 = vpop.permute.xlu0 %697 }
 0x34b   : > { %v781_v50 = vpop.permute.xlu1 %780  ;;  %1339 = vmatmul.mubr.msk.f32.vlgmr.msra.gmra.mrb[4].mxu0 %vm358_vm11, %v698_v49 }
 0x34c   : > { %1345 = vmatprep.mubr.msk.f32.mxu1 %vm358_vm11, %v781_v50  ;;  %1399 = vmatpush3.bf16.msra.mxu0 %v1600_v30 }
 0x34d   : > { %1405 = vmatprep.subr.bf16.mxu0 %v1600_v30 }
 0x34e   : > { %v783_v51 = vpop.permute.xlu0 %782 }
 0x34f   : > { %v866_v52 = vpop.permute.xlu1 %865  ;;  %1346 = vmatmul.mubr.msk.f32.vlgmr.msra.gmra.mrb[6].mxu1 %vm358_vm11, %v783_v51 }
 0x350   : > { %1352 = vmatprep.mubr.msk.f32.mxu0 %vm358_vm11, %v866_v52  ;;  %1403 = vmatpush3.bf16.msra.mxu1 %v1600_v30 }
 0x352   : > { %v868_v53 = vpop.permute.xlu0 %867 }
 0x353   : > { %v951_v54 = vpop.permute.xlu1 %950  ;;  %1353 = vmatmul.mubr.msk.f32.vlgmr.msra.gmra.mrb[6].mxu0 %vm358_vm11, %v868_v53 }
 0x354   : > { %1359 = vmatprep.mubr.msk.f32.mxu1 %vm358_vm11, %v951_v54  ;;  %1407 = vmatpush3.bf16.msra.mxu0 %v1600_v30 }
 0x356   : > { %v953_v55 = vpop.permute.xlu0 %952 }
 0x357   : > { %v1036_v56 = vpop.permute.xlu1 %1035  ;;  %1360 = vmatmul.mubr.msk.f32.vlgmr.msra.gmra.mrb[8].mxu1 %vm358_vm11, %v953_v55 }
 0x358   : > { %1366 = vmatprep.mubr.msk.f32.mxu0 %vm358_vm11, %v1036_v56 }
 0x35a   : > { %v1038_v57 = vpop.permute.xlu0 %1037 }
 0x35b   : > { %1367 = vmatmul.mubr.msk.f32.vlgmr.msra.gmra.mrb[8].mxu0 %vm358_vm11, %v1038_v57 }
 0x39f   : > { %v1312_v58 = vpop.f32.mrb[0].mxu1 }
 0x3a0   : > { %v431_v59 = vpop.f32.mrb[1].mxu1 }
 0x412   : > { %v1319_v60 = vpop.f32.mrb[2].mxu1 }
 0x413   : > { %v524_v61 = vmax.f32 %v1312_v58, %v1319_v60  ;;  %v514_v62 = vpop.f32.mrb[3].mxu1 }
 0x414   : > { %v523_v63 = vmax.f32 %v431_v59, %v514_v62 }
 0x416   : > { %v1326_v0 = vpop.f32.mrb[2].mxu0 }
 0x417   : > { %v609_v1 = vmax.f32 %v524_v61, %v1326_v0  ;;  %v599_v2 = vpop.f32.mrb[3].mxu0 }
 0x418   : > { %v608_v3 = vmax.f32 %v523_v63, %v599_v2 }
 0x41a   : > { %v1333_v4 = vpop.f32.mrb[4].mxu1 }
 0x41b   : > { %v694_v5 = vmax.f32 %v609_v1, %v1333_v4  ;;  %v684_v6 = vpop.f32.mrb[5].mxu1 }
 0x41c   : > { %v693_v7 = vmax.f32 %v608_v3, %v684_v6 }
 0x41e   : > { %v1340_v8 = vpop.f32.mrb[4].mxu0 }
 0x41f   : > { %v779_v9 = vmax.f32 %v694_v5, %v1340_v8  ;;  %v769_v10 = vpop.f32.mrb[5].mxu0 }
 0x420   : > { %v778_v11 = vmax.f32 %v693_v7, %v769_v10 }
 0x422   : > { %v1347_v12 = vpop.f32.mrb[6].mxu1 }
 0x423   : > { %v864_v13 = vmax.f32 %v779_v9, %v1347_v12  ;;  %v854_v14 = vpop.f32.mrb[7].mxu1 }
 0x424   : > { %v863_v15 = vmax.f32 %v778_v11, %v854_v14 }
 0x426   : > { %v1354_v16 = vpop.f32.mrb[6].mxu0 }
 0x427   : > { %v949_v17 = vmax.f32 %v864_v13, %v1354_v16  ;;  %v939_v18 = vpop.f32.mrb[7].mxu0 }
 0x428   : > { %v948_v19 = vmax.f32 %v863_v15, %v939_v18 }
 0x42a   : > { %v1361_v20 = vpop.f32.mrb[8].mxu1 }
 0x42b   : > { %v1034_v21 = vmax.f32 %v949_v17, %v1361_v20  ;;  %v1024_v22 = vpop.f32.mrb[9].mxu1 }
 0x42c   : > { %v1033_v23 = vmax.f32 %v948_v19, %v1024_v22 }
 0x42e   : > { %v1368_v24 = vpop.f32.mrb[8].mxu0 }
 0x42f   : > { %v1119_v25 = vmax.f32 %v1034_v21, %v1368_v24  ;;  %v1109_v26 = vpop.f32.mrb[9].mxu0 }
 0x430   : > { %v1118_v27 = vmax.f32 %v1033_v23, %v1109_v26 }
 0x431   : > { %v1121_v28 = vmax.f32 %v1119_v25, 0.0 }
 0x432   : > { %v1120_v29 = vmax.f32 %v1118_v27, 0.0 }
 0x433   : > { %v1123_v30 = vadd.f32 0.01, %v1121_v28 }
 0x434   : > { %v1122_v31 = vadd.f32 0.01, %v1120_v29 }
 0x435   : > { %1468 = vlog2.f32 %v1123_v30 }
 0x436   : > { %1470 = vlog2.f32 %v1122_v31 }
 0x43f   : > { %v1469_v32 = vpop.eup %1468 }
 0x440   : > { %v1471_v33 = vpop.eup %1470  ;;  %v1127_v34 = vmul.f32 0.6931472, %v1469_v32 }
 0x441   : > { %v1125_v35 = vmul.f32 0.6931472, %v1471_v33 }
 0x442   : > { %1131 = vst.msk [vmem:[%s203_s6 + $0x8] sm:$0xf] %vm1130_vm13, %v1127_v34 }
 0x443   : > { %1129 = vst.msk [vmem:[%s203_s6] sm:$0xff] %vm1128_vm14, %v1125_v35 }
 0x444 PF: > { %s13_s16 = sadd.s32 1, %s1510_s16   ;;  %s1669_s12 = smov %s1502_s14 }
 0x445   : > { %p10_p7 = scmp.ge.s32.totalorder %s13_s16, 6   ;;  %s1670_s13 = smov %s1506_s15 }
 0x446   : > { %s1671_s14 = smov %s1674_s17  ;;  %s1672_s15 = smov %s1678_s18 }
 0x447   :  { %12 = sbr.rel (!%p10_p7) target bundleno = 3 (0x3), region = 62 }

</bundles_post_ra>
